<compile_context>
chip_gen: v7x
topology: tpu7x:2x2x1
jax: 0.10.0
libtpu: 0.0.40
codegen_flags: <defaults>
</compile_context>

<pallas_src>
import jax
import jax.numpy as jnp
from jax.experimental import pallas as pl
from jax.experimental.pallas import tpu as pltpu


def _residual_pointwise_kernel(x_ref, w_ref, b_ref, o_ref):
    # x_ref: (C, tl)  -- spatial on lanes (dense last axis)
    # w_ref: (C_out, C_in) resident weight
    # b_ref: (C_out, 1)    resident bias (broadcasts over lanes)
    # o_ref: (C, tl)
    x = x_ref[...]
    # fn(x): 1x1 conv == channel-mixing matmul, f32 accumulation on the MXU.
    y = jnp.dot(w_ref[...], x, preferred_element_type=jnp.float32)
    y = y + b_ref[...].astype(jnp.float32)
    # Residual: fn(x) + x, done in f32, single cast at the store.
    o_ref[...] = (y + x.astype(jnp.float32)).astype(o_ref.dtype)


def residual_pointwise_conv(x_nchw, w, b, *, tl=512):
    """Residual(Conv2d(C, C, 1))(x) with NCHW input/output.

    x_nchw: (N, C, H, W)
    w:      (C_out, C_in)  -- PyTorch conv weight (C_out, C_in, 1, 1) squeezed
    b:      (C_out,)
    """
    N, C, H, W = x_nchw.shape
    S = H * W
    # Free reshape (row-major NCHW keeps the spatial axis contiguous) — no
    # HBM transpose round-trips.
    x3 = x_nchw.reshape(N, C, S)

    # Lane tile: must be a multiple of 128 or the full extent.
    if S % 128 == 0:
        tl_eff = max(128, (min(tl, S) // 128) * 128)
    else:
        tl_eff = S  # full-extent block is always legal

    grid = (N, pl.cdiv(S, tl_eff))
    b2 = b.reshape(C, 1)
    itemsize = jnp.dtype(x_nchw.dtype).itemsize

    out3 = pl.pallas_call(
        _residual_pointwise_kernel,
        out_shape=jax.ShapeDtypeStruct((N, C, S), x_nchw.dtype),
        grid_spec=pltpu.PrefetchScalarGridSpec(
            num_scalar_prefetch=0,
            grid=grid,
            in_specs=[
                # x tile: batch squeezed, full channel extent, lane-dense spatial tile
                pl.BlockSpec((None, C, tl_eff), lambda n, s: (n, 0, s)),
                # weight: constant block index -> resident in VMEM across the grid
                pl.BlockSpec((C, C), lambda n, s: (0, 0)),
                # bias: constant block index -> resident
                pl.BlockSpec((C, 1), lambda n, s: (0, 0)),
            ],
            out_specs=pl.BlockSpec((None, C, tl_eff), lambda n, s: (n, 0, s)),
        ),
        compiler_params=pltpu.CompilerParams(
            dimension_semantics=("parallel", "parallel"),
        ),
        cost_estimate=pl.CostEstimate(
            flops=2 * N * S * C * C,
            transcendentals=0,
            bytes_accessed=(2 * N * C * S + C * C + C) * itemsize,
        ),
    )(x3, w, b2)

    return out3.reshape(N, C, H, W)


if __name__ == "__main__":
    # Small shapes consistent with the module: batch=2, channels=4, spatial=16.
    N, C, H, W = 2, 4, 16, 16
    key = jax.random.PRNGKey(0)
    kx, kw, kb = jax.random.split(key, 3)

    x = jax.random.normal(kx, (N, C, H, W), dtype=jnp.float32)

    # Deterministic "Conv2d(C, C, 1)" parameters.  PyTorch weight layout is
    # (C_out, C_in, 1, 1); we squeeze to (C_out, C_in) and use it directly.
    w_conv = jax.random.normal(kw, (C, C, 1, 1), dtype=jnp.float32) * 0.1
    b_conv = jax.random.normal(kb, (C,), dtype=jnp.float32) * 0.1
    w2d = w_conv[:, :, 0, 0]  # (C_out, C_in)

    out = residual_pointwise_conv(x, w2d, b_conv)
    out = jax.block_until_ready(out)

    # Reference in plain JAX: Residual(1x1 conv) semantics, fn(x) + x.
    ref = jnp.einsum("oc,nchw->nohw", w2d, x) + b_conv[None, :, None, None] + x
    assert out.shape == x.shape
    assert jnp.allclose(out, ref, atol=1e-5, rtol=1e-5)

    # TODO(synk): Residual wraps an arbitrary `fn`; this kernel fuses the
    # representative pointwise-conv case.  Other fns need their own fused body.
    print("KERNEL_OK")
</pallas_src>

<mosaic_0001>
module attributes {stable_mosaic.version = 11 : i64} {
  func.func @_residual_pointwise_kernel(%arg0: i32, %arg1: i32, %arg2: memref<1x4x256xf32, #tpu.memory_space<vmem>>, %arg3: memref<4x4xf32, #tpu.memory_space<vmem>>, %arg4: memref<4x1xf32, #tpu.memory_space<vmem>>, %arg5: memref<1x4x256xf32, #tpu.memory_space<vmem>>) attributes {dimension_semantics = [#tpu.dimension_semantics<parallel>, #tpu.dimension_semantics<parallel>], iteration_bounds = array<i64: 2, 1>, scalar_prefetch = 0 : i64, scratch_operands = 0 : i64, tpu.core_type = #tpu.core_type<tc>, window_params = [{transform_indices = @transform_0, window_bounds = array<i64: 1, 4, 256>}, {pipeline_mode = #tpu.pipeline_mode<synchronous>, transform_indices = @transform_1, window_bounds = array<i64: 4, 4>}, {pipeline_mode = #tpu.pipeline_mode<synchronous>, transform_indices = @transform_2, window_bounds = array<i64: 4, 1>}, {transform_indices = @transform_3, window_bounds = array<i64: 1, 4, 256>}]} {
    %c0 = arith.constant 0 : index
    %c0_0 = arith.constant 0 : index
    %c0_1 = arith.constant 0 : index
    %0 = vector.load %arg2[%c0, %c0_0, %c0_1] : memref<1x4x256xf32, #tpu.memory_space<vmem>>, vector<1x4x256xf32>
    %1 = vector.shape_cast %0 : vector<1x4x256xf32> to vector<4x256xf32>
    %c0_2 = arith.constant 0 : index
    %c0_3 = arith.constant 0 : index
    %2 = vector.load %arg3[%c0_2, %c0_3] : memref<4x4xf32, #tpu.memory_space<vmem>>, vector<4x4xf32>
    %cst = arith.constant dense<0.000000e+00> : vector<4x256xf32>
    %3 = tpu.matmul %2, %1, %cst {dimension_numbers = #tpu.dot_dimension_numbers<[1], [0], [0], [1], [0, 0, 1, 1], [], []>} : vector<4x4xf32>, vector<4x256xf32>, vector<4x256xf32> -> vector<4x256xf32>
    %c0_4 = arith.constant 0 : index
    %c0_5 = arith.constant 0 : index
    %4 = vector.load %arg4[%c0_4, %c0_5] : memref<4x1xf32, #tpu.memory_space<vmem>>, vector<4x1xf32>
    %5 = vector.broadcast %4 : vector<4x1xf32> to vector<4x256xf32>
    %6 = arith.addf %3, %5 : vector<4x256xf32>
    %7 = arith.addf %6, %1 : vector<4x256xf32>
    %c0_6 = arith.constant 0 : index
    %c0_7 = arith.constant 0 : index
    %c0_8 = arith.constant 0 : index
    %8 = vector.load %arg5[%c0_6, %c0_7, %c0_8] : memref<1x4x256xf32, #tpu.memory_space<vmem>>, vector<1x4x256xf32>
    %9 = vector.shape_cast %8 : vector<1x4x256xf32> to vector<4x256xf32>
    %10 = vector.shape_cast %7 : vector<4x256xf32> to vector<1x4x256xf32>
    tpu.vector_store %arg5[%c0_6, %c0_7, %c0_8], %10 {strides = array<i32>} : memref<1x4x256xf32, #tpu.memory_space<vmem>>, vector<1x4x256xf32>,
    return
  }
  func.func @transform_0(%arg0: i32, %arg1: i32) -> (i32, i32, i32) {
    %c0_i32 = arith.constant 0 : i32
    %c0_i32_0 = arith.constant 0 : i32
    return %arg0, %c0_i32, %arg1 : i32, i32, i32
  }
  func.func @transform_1(%arg0: i32, %arg1: i32) -> (i32, i32) {
    %c0_i32 = arith.constant 0 : i32
    %c0_i32_0 = arith.constant 0 : i32
    %c0_i32_1 = arith.constant 0 : i32
    return %c0_i32, %c0_i32_0 : i32, i32
  }
  func.func @transform_2(%arg0: i32, %arg1: i32) -> (i32, i32) {
    %c0_i32 = arith.constant 0 : i32
    %c0_i32_0 = arith.constant 0 : i32
    %c0_i32_1 = arith.constant 0 : i32
    return %c0_i32, %c0_i32_0 : i32, i32
  }
  func.func @transform_3(%arg0: i32, %arg1: i32) -> (i32, i32, i32) {
    %c0_i32 = arith.constant 0 : i32
    %c0_i32_0 = arith.constant 0 : i32
    return %arg0, %c0_i32, %arg1 : i32, i32, i32
  }
}

</mosaic_0001>

<bundles_post_ra>
// kernel: tpu_custom_call.1
= control target key start
LH: loop header
LB: loop body
LE: loop exit
PB: predicated region body
PF: predicated region fallthrough
CT: control target
= control target key end

     0   :  { %8 = vsyncpa [#allocation3], 0  ;;  %s808_s0 = inlined_call_operand.hbm [shape: f32[2,4,256], index: 0, kind: input, shape index: {}]   ;;  %s809_s1 = inlined_call_operand.vmem [shape: f32[4,4], index: 1, kind: input, shape index: {}]   ;;  %s810_s2 = inlined_call_operand.vmem [shape: f32[4,1], index: 2, kind: input, shape index: {}]   ;;  %s811_s3 = inlined_call_operand.hbm [shape: f32[2,4,256], index: 3, kind: output, shape index: {}]  }
   0x1   :  { %10 = vsyncpa [#allocation3 + $0x1], 0 }
   0x2   :  { %11 = vsyncpa [#allocation4], 0 }
   0x3   :  { %13 = vsyncpa [#allocation4 + $0x1], 0  ;;  %s630_s12 = smov 0   ;;  %s632_s13 = smov 0  }
   0x4   :  { %s634_s14 = smov 0   ;;  %s636_s15 = smov 0  }
   0x5   :  { %s638_s16 = smov 0   ;;  %s640_s17 = smov 0  }
   0x6 LB: > { %s406_s18 = sadd.s32 4294967295, %s604_s17   ;;  %s407_s19 = sadd.s32 4294967294, %s604_s17   ;;  %s604_s17 = sphi %s640_s17, %s19_s17   ;;  %s600_s16 = sphi %s638_s16, %s827_s16   ;;  %s596_s15 = sphi %s636_s15, %s826_s15   ;;  %s592_s14 = sphi %s634_s14, %s825_s14   ;;  %s588_s13 = sphi %s632_s13, %s824_s13   ;;  %s584_s12 = sphi %s630_s12, %s823_s12  }
   0x7   : > { %s31_s20 = sadd.s32 1, %s600_s16  ;;  %s40_s21 = sadd.s32 1, %s592_s14 }
   0x8   : > { %p33_p0 = scmp.ge.s32.totalorder %s31_s20, 2  ;;  %p47_p1 = scmp.ne.s32.totalorder %s592_s14, %s588_s13 }
   0x9   : > { %p48_p2 = scmp.eq.s32.totalorder %s604_s17, 0  ;;  %p53_p3 = scmp.ne.s32.totalorder %s588_s13, %s584_s12 }
   0xa   : > { %s829_s20 = smov (%p33_p0, %s31_s20), 0  ;;  %p54_p5 = scmp.eq.s32.totalorder %s406_s18, 0 }
   0xb   : > { %p671_p4 = por %p48_p2, %p47_p1  ;;  %s35_s23 = ssub.s32 %s600_s16, %s829_s20 }
   0xc   : > { %p121_p6 = scmp.eq.s32.totalorder %s406_s18, 1  ;;  %p38_p7 = scmp.eq.s32.totalorder %s35_s23, 0 }
   0xd   : > { %p677_p8 = por %p54_p5, %p53_p3  ;;  %p127_p10 = scmp.eq.s32.totalorder %s407_s19, 1 }
   0xe   : > { %p681_p9 = por %p121_p6, %p47_p1  ;;  %p438_p13 = scmp.lt.s32.totalorder %s604_s17, 2 }
   0xf   : > { %s686_s26 = scalar_select %p38_p7, %s592_s14, %s40_s21  }
  0x10   : > { %s815_s25 = scalar_select %p681_p9, 1, 0 }
  0x11   : > { %p688_p11 = por %p127_p10, %p53_p3  ;;  %s153_s28 = sand.u32 1, %s592_s14  }
  0x12   : > { %s410_s29 = sshll.u32 %s153_s28, 3  ;;  %s424_s30 = sshll.u32 %s600_s16, 7 }
  0x13   : > { %s816_s27 = scalar_select %p688_p11, 1, 0 }
  0x14   : > { %s699_s6 = scalar_lea.hbm %s808_s0, %s424_s30  ;;  %s157_s7 = scalar_lea.vmem [#allocation2], %s410_s29 }
  0x15   : > { %s167_s8 = sshll.u32 %s157_s7, 4  ;;  %p705_p0 = pnand %p438_p13, %p671_p4  ;;  %s701_s8 = int_to_ptr.vmem [resolvable:$true] %s167_s8 }
  0x16   : > { %s154_s10 = scalar_lea.sflag [#allocation3], %s153_s28  ;;  %s492_s11 = scalar_lea.hbm %s699_s6, 128 }
  0x17   : > { %p493_p3 = scmp.ne.s32.totalorder %s699_s6, %s492_s11  ;;  %p494_p5 = pneg %p705_p0 }
  0x18   : > { %s497_s21 = scalar_lea.hbm %s808_s0, 256  ;;  %p498_p4 = scmp.lt.u32.totalorder %s699_s6, %s808_s0 }
  0x19   : > { %p495_p6 = pnand %p494_p5, %p493_p3  ;;  %p499_p10 = scmp.lt.u32.totalorder %s497_s21, %s492_s11 }
  0x1a   : > { %p501_p12 = scmp.lt.u32.totalorder %s492_s11, %s699_s6 }
  0x1b   : > { %p496_p7 = pneg %p495_p6  ;;  %p500_p13 = por %p499_p10, %p498_p4 }
  0x1d   : > { %p502_p1 = por %p501_p12, %p500_p13 }
  0x1f   : > { %p503_p2 = pnand %p502_p1, %p496_p7 }
  0x21   : > { %506 = shalt.err (!%p503_p2)
}
  0x22   : > { %s507_s28 = scalar_lea.vmem %s701_s8, 128  ;;  %s606_s29 = smov [#allocation2]  }
  0x23   : > { %p508_p3 = scmp.ne.s32.totalorder %s701_s8, %s507_s28  ;;  %s512_s30 = sshll.u32 %s606_s29, 4  ;;  %s513_s30 = int_to_ptr.vmem [resolvable:$false] %s512_s30 }
  0x24   : > { %s514_s4 = scalar_lea.vmem %s513_s30, 256  ;;  %p515_p9 = scmp.lt.s32.totalorder %s701_s8, %s513_s30 }
  0x25   : > { %p510_p6 = pnand %p508_p3, %p494_p5  ;;  %p516_p4 = scmp.lt.s32.totalorder %s514_s4, %s507_s28 }
  0x27   : > { %p511_p11 = pneg %p510_p6  ;;  %p517_p10 = por %p516_p4, %p515_p9 }
  0x29   : > { %p518_p12 = pnand %p517_p10, %p511_p11 }
  0x2b   : > { %521 = shalt.err (!%p518_p12)
}
  0x2c   : > { %433 = dma.hbm_to_vmem [thread:$0]  (!%p705_p0), %s699_s6, 128, %s701_s8, %s154_s10  }
  0x2d   : > { %p818_p1 = scmp.lt.s32.totalorder %s604_s17, 3  ;;  %p819_p2 = scmp.ge.s32.totalorder %s604_s17, 1 }
  0x2f   : > { %p173_p5 = pnand %p819_p2, %p818_p1 }
  0x30   : > { %s741_s5 = sand.u32 (!%p173_p5), 1, %s588_s13  }
  0x31   : > { %176 = sbr.rel (%p173_p5) target bundleno = 295 (0x127), region = 32  ;;  %s414_s7 = sshll.u32 (!%p173_p5), %s741_s5, 3 }
  0x32   : > { %s179_s11 = scalar_lea.sflag (!%p173_p5), [#allocation3], %s741_s5  ;;  %s182_s18 = scalar_lea.vmem (!%p173_p5), [#allocation2], %s414_s7 }
  0x38   : > { %575 = dma.done.wait (%p677_p8), %s179_s11, 128  }
  0x39   : > { %577 = vsyncadd (%p677_p8), %s179_s11, 4294967168  ;;  %v607_v0 = vmov 0.0   ;;  %v608_v1 = vmov 0   ;;  %v207_v2 = vld [vmem:[%s182_s18] sm:$0xff]  ;;  %vm221_vm0 = vcmask 1043456   ;;  %vm217_vm1 = vcmask 31744  }
  0x3a   : > { %290 = vmatprep.mubr.f32.mxu0 %v607_v0  ;;  %490 = vset.pattern.permute.xlu0 %v608_v1  ;;  %v209_v3 = vld [vmem:[%s810_s2] sm:$0xf]  ;;  %v216_v4 = vcombine.high %v207_v2, %v207_v2  ;;  %s425_s24 = sshll.u32 %s596_s15, 7  ;;  %s204_s19 = scalar_lea.vmem [#allocation5], %s414_s7 }
  0x3b   : > { %212 = vperm.xlu0 %490, %v209_v3   ;;  %v208_v5 = vld [vmem:[%s809_s1] sm:$0xf]  ;;  %s322_s21 = sshll.u32 %s204_s19, 4  ;;  %s759_s28 = scalar_lea.hbm %s811_s3, %s425_s24  ;;  %s761_s21 = int_to_ptr.vmem [resolvable:$true] %s322_s21 }
  0x3c   : > { %416 = vmatprep.subr.msk.mxu0 %vm221_vm0, %v216_v4  ;;  %s306_s29 = scalar_lea.sflag [#allocation4], %s741_s5  ;;  %s522_s30 = scalar_lea.vmem %s761_s21, 128 }
  0x3d   : > { %417 = vmatpush1.msk.msra.mxu0 %vm221_vm0, %v207_v2  ;;  %p523_p8 = scmp.ne.s32.totalorder %s761_s21, %s522_s30  ;;  %p820_p9 = scmp.ne.s32.totalorder %s815_s25, 0 }
  0x3e   : > { %418 = vmatmul.mubr.msk.f32.vlgmr.msra.gmra.mrb[0].mxu0 %vm217_vm1, %v208_v5  ;;  %s609_s15 = smov [#allocation5]  }
  0x3f   : > { %p524_p11 = pnand %p523_p8, %p820_p9  ;;  %s526_s4 = sshll.u32 %s609_s15, 4  ;;  %s527_s4 = int_to_ptr.vmem [resolvable:$false] %s526_s4 }
  0x40   : > { %s528_s7 = scalar_lea.vmem %s527_s4, 256  ;;  %p529_p7 = scmp.lt.s32.totalorder %s761_s21, %s527_s4 }
  0x41   : > { %p525_p0 = pneg %p524_p11  ;;  %p530_p13 = scmp.lt.s32.totalorder %s528_s7, %s522_s30 }
  0x43   : > { %p531_p3 = por %p530_p13, %p529_p7 }
  0x45   : > { %p532_p6 = pnand %p531_p3, %p525_p0 }
  0xba   : > { %v213_v6 = vpop.permute.xlu0 %212 }
 0x111   : > { %v292_v7 = vpop.f32.mrb[0].mxu0 }
 0x112   : > { %v293_v8 = vadd.f32 %v292_v7, %v213_v6  ;;  %v294_v9 = vpop.f32.mrb[1].mxu0 }
 0x113   : > { %v295_v10 = vadd.f32 %v294_v9, %v213_v6 }
 0x114   : > { %v298_v11 = vadd.f32 %v293_v8, %v207_v2 }
 0x115   : > { %v299_v12 = vadd.f32 %v295_v10, %v216_v4 }
 0x117   : > { %v302_v13 = vcombine.low %v298_v11, %v299_v12 }
 0x119   : > { %304 = vst [vmem:[%s204_s19] sm:$0xff] %v302_v13 }
 0x11a   : > { %535 = shalt.err (!%p532_p6)
}
 0x11b   : > { %s536_s5 = scalar_lea.hbm %s759_s28, 128  ;;  %s540_s6 = scalar_lea.hbm %s811_s3, 256 }
 0x11c   : > { %p537_p4 = scmp.ne.s32.totalorder %s759_s28, %s536_s5  ;;  %p541_p1 = scmp.lt.u32.totalorder %s759_s28, %s811_s3 }
 0x11d   : > { %p542_p2 = scmp.lt.u32.totalorder %s540_s6, %s536_s5  ;;  %p544_p8 = scmp.lt.u32.totalorder %s536_s5, %s759_s28 }
 0x11e   : > { %p538_p10 = pnand %p537_p4, %p820_p9 }
 0x11f   : > { %p543_p5 = por %p542_p2, %p541_p1 }
 0x120   : > { %p539_p12 = pneg %p538_p10 }
 0x121   : > { %p545_p11 = por %p544_p8, %p543_p5 }
 0x123   : > { %p546_p0 = pnand %p545_p11, %p539_p12 }
 0x125   : > { %549 = shalt.err (!%p546_p0)
}
 0x126   : > { %428 = dma.vmem_to_hbm [thread:$0]  (%p820_p9), %s761_s21, 128, %s759_s28, %s306_s29  }
 0x127 PF: > { %s334_s10 = sand.u32 1, %s584_s12   ;;  %p821_p7 = scmp.ne.s32.totalorder %s816_s27, 0 }
 0x128   : > { %p822_p13 = scmp.ge.s32.totalorder %s604_s17, 2  ;;  %s335_s24 = scalar_lea.sflag [#allocation4], %s334_s10 }
 0x12a   : > { %p435_p3 = pnand %p822_p13, %p821_p7 }
 0x12c   : > { %579 = dma.done.wait (!%p435_p3), %s335_s24, 128  }
 0x12d   : > { %581 = vsyncadd (!%p435_p3), %s335_s24, 4294967168  ;;  %s19_s17 = sadd.s32 1, %s604_s17   ;;  %s823_s12 = smov %s588_s13 }
 0x12e   : > { %p16_p6 = scmp.ge.s32.totalorder %s19_s17, 4   ;;  %s824_s13 = smov %s592_s14 }
 0x12f   : > { %s825_s14 = smov %s686_s26  ;;  %s826_s15 = smov %s600_s16 }
 0x130   : > { %s827_s16 = smov %s829_s20  ;;  %18 = sbr.rel (!%p16_p6) target bundleno = 6 (0x6), region = 77 }
 0x137   :  { %340 = vsyncpa [#allocation3], 1 }
 0x138   :  { %342 = vsyncpa [#allocation3 + $0x1], 1 }
 0x139   :  { %343 = vsyncpa [#allocation4], 1 }
 0x13a   :  { %345 = vsyncpa [#allocation4 + $0x1], 1 }

</bundles_post_ra>
